<compile_context>
chip_gen: v5e
topology: v5e:2x2
jax: 0.10.0
libtpu: 0.0.40
codegen_flags: <defaults>
</compile_context>

<pallas_src>
import functools

import jax
import jax.numpy as jnp
from jax import lax
from jax.experimental import pallas as pl
from jax.experimental.pallas import tpu as pltpu

_EPS = 1e-5
_VMEM_LIMIT = 32 * 1024 * 1024


# ----------------------------------------------------------------------------
# Kernel 1: all weight-generating MLPs in a single launch
# ----------------------------------------------------------------------------
def _gen_weights_kernel(*refs, num_gen):
    cfg = refs[0][...]
    in_refs = refs[1:1 + 4 * num_gen]
    out_refs = refs[1 + 4 * num_gen:]
    for g in range(num_gen):
        w1, b1, w2, b2 = in_refs[4 * g:4 * g + 4]
        h = jnp.maximum(
            jnp.dot(cfg, w1[...], preferred_element_type=jnp.float32) + b1[...],
            0.0)
        out_refs[g][...] = (
            jnp.dot(h, w2[...], preferred_element_type=jnp.float32) + b2[...])


def generate_weights(cfg, param_list):
    """param_list: list of (w1, b1, w2, b2); returns list of (1, n_g) arrays."""
    flat, out_shapes = [], []
    for (w1, b1, w2, b2) in param_list:
        flat += [w1, b1, w2, b2]
        out_shapes.append(jax.ShapeDtypeStruct((1, w2.shape[1]), jnp.float32))
    outs = pl.pallas_call(
        functools.partial(_gen_weights_kernel, num_gen=len(param_list)),
        out_shape=tuple(out_shapes),
        compiler_params=pltpu.CompilerParams(vmem_limit_bytes=_VMEM_LIMIT),
    )(cfg, *flat)
    return list(outs)


# ----------------------------------------------------------------------------
# Kernel 2: fused bottleneck body (convs + BNs + shortcut + add + relu)
# ----------------------------------------------------------------------------
def _bottleneck_fused_kernel(xpad_ref, mask_ref, w1_ref, w2_ref, w3_ref, *rest,
                             stride, has_shortcut, hw):
    if has_shortcut:
        wsc_ref, o_ref = rest
    else:
        (o_ref,) = rest

    N, Hp, Wp, in_c = xpad_ref.shape          # W already padded to a multiple of 8
    H, W = hw                                 # true (unpadded) spatial extent
    mid_c = w1_ref.shape[0]
    out_c = w3_ref.shape[0]
    _, Ho, Wo, _ = o_ref.shape
    P = N * Ho * Wo
    f32 = jnp.float32
    dn_t = (((1,), (1,)), ((), ()))           # (rows,Cin) . (Cout,Cin) -> (rows,Cout)

    def bn(v, m):                             # BatchNorm2d(affine=False), batch stats
        mean = jnp.sum(v, axis=0, keepdims=True) * (1.0 / m)
        cen = v - mean
        var = jnp.sum(cen * cen, axis=0, keepdims=True) * (1.0 / m)   # biased var
        return cen * lax.rsqrt(var + _EPS)

    def tap(x4, kh, kw, c):                   # (strided) tap read + flatten
        if stride == 1:
            xs = x4[:, kh:kh + Ho, kw:kw + Wo, :]
        else:                                 # only the strided output positions
            xs = x4[:, kh:kh + stride * (Ho - 1) + 1:stride,
                       kw:kw + stride * (Wo - 1) + 1:stride, :]
        return xs.reshape(P, c)

    xpad = xpad_ref[...]
    mask = mask_ref[...]                      # (N*Hp*Wp, 1): 1 on valid pixels
    cnt = float(N * H * W)

    # ---- conv1 (1x1, no bias) over the padded extent: zero ring stays zero ----
    y1 = lax.dot_general(xpad.reshape(N * Hp * Wp, in_c), w1_ref[...], dn_t,
                         preferred_element_type=f32)
    y1 = jnp.maximum(y1, 0.0)                 # relu (padding rows remain exactly 0)
    # BN1 statistics over the N*H*W valid pixels only (ring contributes 0 to sums)
    mean1 = jnp.sum(y1, axis=0, keepdims=True) * (1.0 / cnt)
    cen1 = (y1 - mean1) * mask                # re-zero the padding ring
    var1 = jnp.sum(cen1 * cen1, axis=0, keepdims=True) * (1.0 / cnt)
    y1n = (cen1 * lax.rsqrt(var1 + _EPS)).reshape(N, Hp, Wp, mid_c)

    # ---- conv2 (3x3, pad=1, stride): 9 shifted matmuls on the VMEM tile ----
    w2 = w2_ref[...]                          # (3, 3, Cin, Cout)
    acc = jnp.zeros((P, mid_c), f32)
    for kh in range(3):
        for kw in range(3):
            acc = acc + jnp.dot(tap(y1n, kh, kw, mid_c), w2[kh, kw],
                                preferred_element_type=f32)
    y2 = bn(jnp.maximum(acc, 0.0), P)         # norm2(relu(conv2))

    # ---- conv3 (1x1) + BN3 (no relu before the norm) ----
    y3 = bn(lax.dot_general(y2, w3_ref[...], dn_t, preferred_element_type=f32), P)

    # ---- shortcut branch ----
    xs = tap(xpad, 1, 1, in_c)                # (strided) 1x1 input positions
    if has_shortcut:
        sc = bn(lax.dot_general(xs, wsc_ref[...], dn_t,
                                preferred_element_type=f32), P)
    else:
        sc = xs                               # identity (stride==1, in_c==out_c)

    o_ref[...] = jnp.maximum(y3 + sc, 0.0).reshape(N, Ho, Wo, out_c)


# ----------------------------------------------------------------------------
# Parameter init + forward wrapper
# ----------------------------------------------------------------------------
def _linear_params(key, in_f, out_f):
    """PyTorch-style uniform(-1/sqrt(in), 1/sqrt(in)) init; stored as (in, out)."""
    k1, k2 = jax.random.split(key)
    bound = 1.0 / (in_f ** 0.5)
    w = jax.random.uniform(k1, (in_f, out_f), jnp.float32, -bound, bound)
    b = jax.random.uniform(k2, (1, out_f), jnp.float32, -bound, bound)
    return w, b


def init_bottleneck_pruningnet(key, in_channels, out_channels, stride=1):
    expansion = 4
    mid_channels = out_channels // expansion
    keys = jax.random.split(key, 8)
    params = {
        "fc11": _linear_params(keys[0], 3, 32),
        "fc12": _linear_params(keys[1], 32, mid_channels * in_channels),
        "fc21": _linear_params(keys[2], 3, 32),
        "fc22": _linear_params(keys[3], 32, mid_channels * mid_channels * 9),
        "fc31": _linear_params(keys[4], 3, 32),
        "fc32": _linear_params(keys[5], 32, out_channels * mid_channels),
    }
    if stride != 1 or in_channels != out_channels:
        params["fc_shortcut1"] = _linear_params(keys[6], 3, 32)
        params["fc_shortcut2"] = _linear_params(
            keys[7], 32, out_channels * in_channels)
    return params


def bottleneck_pruningnet_forward(params, x_nchw, scale_ids, *,
                                  in_channels, out_channels, channel_scales,
                                  stride=1):
    expansion = 4
    mid_channels = out_channels // expansion
    s0 = float(channel_scales[scale_ids[0]])
    s1 = float(channel_scales[scale_ids[1]])
    s2 = float(channel_scales[scale_ids[2]])
    in_c = int(in_channels * s0)
    mid_c = int(mid_channels * s1)
    out_c = int(out_channels * s2)
    assert x_nchw.shape[1] == in_c, "input must carry the pruned channel count"

    has_shortcut = (stride != 1) or (in_channels != out_channels)
    if not has_shortcut:
        assert in_c == out_c, "identity shortcut needs matching pruned channels"

    cfg = jnp.array([[s0, s1, s2]], jnp.float32)

    # --- all weight-generating MLPs in one pallas_call ----------------------
    names = [("fc11", "fc12"), ("fc21", "fc22"), ("fc31", "fc32")]
    if has_shortcut:
        names.append(("fc_shortcut1", "fc_shortcut2"))
    gen = generate_weights(cfg, [params[a] + params[b] for a, b in names])

    w1 = gen[0].reshape(mid_channels, in_channels)[:mid_c, :in_c]      # (Cout, Cin)
    w2 = gen[1].reshape(mid_channels, mid_channels, 3, 3)[:mid_c, :mid_c]
    w2 = jnp.transpose(w2, (2, 3, 1, 0))                               # (3,3,Cin,Cout)
    w3 = gen[2].reshape(out_channels, mid_channels)[:out_c, :mid_c]    # (Cout, Cin)
    wsc = (gen[3].reshape(out_channels, in_channels)[:out_c, :in_c]
           if has_shortcut else None)

    # --- NHWC layout; zero-pad once (W padded up to a multiple of 8) --------
    x = jnp.transpose(x_nchw.astype(jnp.float32), (0, 2, 3, 1))
    N, H, W, _ = x.shape
    Ho = (H - 1) // stride + 1
    Wo = (W - 1) // stride + 1
    w_extra = (-(W + 2)) % 8
    pads = ((0, 0), (1, 1), (1, 1 + w_extra), (0, 0))
    xpad = jnp.pad(x, pads)
    mask = jnp.pad(jnp.ones((N, H, W, 1), jnp.float32), pads)
    mask = mask.reshape(N * xpad.shape[1] * xpad.shape[2], 1)

    ins = [xpad, mask, w1, w2, w3] + ([wsc] if has_shortcut else [])
    out = pl.pallas_call(
        functools.partial(_bottleneck_fused_kernel, stride=stride,
                          has_shortcut=has_shortcut, hw=(H, W)),
        out_shape=jax.ShapeDtypeStruct((N, Ho, Wo, out_c), jnp.float32),
        compiler_params=pltpu.CompilerParams(vmem_limit_bytes=_VMEM_LIMIT),
    )(*ins)
    return jnp.transpose(out, (0, 3, 1, 2))                            # back to NCHW


# ----------------------------------------------------------------------------
# Pure-JAX (XLA) reference replicating the PyTorch forward (for validation)
# ----------------------------------------------------------------------------
def _reference_forward(params, x_nchw, scale_ids, *, in_channels, out_channels,
                       channel_scales, stride=1):
    hi = lax.Precision.HIGHEST
    expansion = 4
    mid_channels = out_channels // expansion
    s0 = float(channel_scales[scale_ids[0]])
    s1 = float(channel_scales[scale_ids[1]])
    s2 = float(channel_scales[scale_ids[2]])
    in_c = int(in_channels * s0)
    mid_c = int(mid_channels * s1)
    out_c = int(out_channels * s2)
    cfg = jnp.array([[s0, s1, s2]], jnp.float32)

    def mlp(a, b):
        (w1, b1), (w2, b2) = params[a], params[b]
        h = jnp.maximum(jnp.dot(cfg, w1, precision=hi) + b1, 0.0)
        return jnp.dot(h, w2, precision=hi) + b2

    def bn(v):
        mean = jnp.mean(v, axis=(0, 2, 3), keepdims=True)
        var = jnp.mean((v - mean) ** 2, axis=(0, 2, 3), keepdims=True)
        return (v - mean) / jnp.sqrt(var + _EPS)

    def conv(v, w, s, pad):
        return lax.conv_general_dilated(
            v, w, (s, s), pad, dimension_numbers=("NCHW", "OIHW", "NCHW"),
            precision=hi)

    x = x_nchw.astype(jnp.float32)
    has_shortcut = (stride != 1) or (in_channels != out_channels)
    if has_shortcut:
        wsc = mlp("fc_shortcut1", "fc_shortcut2").reshape(
            out_channels, in_channels)[:out_c, :in_c]
        sc = bn(conv(x, wsc[:, :, None, None], stride, "VALID"))
    else:
        sc = x
    w1 = mlp("fc11", "fc12").reshape(mid_channels, in_channels)[:mid_c, :in_c]
    r = bn(jnp.maximum(conv(x, w1[:, :, None, None], 1, "VALID"), 0.0))
    w2 = mlp("fc21", "fc22").reshape(mid_channels, mid_channels, 3, 3)[:mid_c, :mid_c]
    r = bn(jnp.maximum(conv(r, w2, stride, ((1, 1), (1, 1))), 0.0))
    w3 = mlp("fc31", "fc32").reshape(out_channels, mid_channels)[:out_c, :mid_c]
    r = bn(conv(r, w3[:, :, None, None], 1, "VALID"))
    return jnp.maximum(r + sc, 0.0)


# ----------------------------------------------------------------------------
if __name__ == "__main__":
    key = jax.random.PRNGKey(0)

    in_channels = 16
    out_channels = 32                      # expansion 4 -> mid_channels = 8
    stride = 1                             # in != out -> learned 1x1 shortcut path
    channel_scales = (0.25, 0.5, 0.75, 1.0)
    scale_ids = (3, 2, 1)                  # -> in_c = 16, mid_c = 6, out_c = 16

    in_c = int(in_channels * channel_scales[scale_ids[0]])

    k_param, k_x = jax.random.split(key)
    params = init_bottleneck_pruningnet(k_param, in_channels, out_channels, stride)

    batch, spatial = 2, 8
    x = jax.random.normal(k_x, (batch, in_c, spatial, spatial), jnp.float32)  # NCHW

    out = bottleneck_pruningnet_forward(
        params, x, scale_ids,
        in_channels=in_channels, out_channels=out_channels,
        channel_scales=channel_scales, stride=stride)
    out = jax.block_until_ready(out)

    expected = (batch, int(out_channels * channel_scales[scale_ids[2]]),
                (spatial - 1) // stride + 1, (spatial - 1) // stride + 1)
    assert out.shape == expected, (out.shape, expected)

    ref = _reference_forward(
        params, x, scale_ids,
        in_channels=in_channels, out_channels=out_channels,
        channel_scales=channel_scales, stride=stride)
    max_err = float(jnp.max(jnp.abs(out - ref)))
    assert max_err < 1e-2, f"mismatch vs XLA reference: {max_err}"

    print("KERNEL_OK")
</pallas_src>

<mosaic_0001>
module attributes {stable_mosaic.version = 11 : i64} {
  func.func @_gen_weights_kernel(%arg0: memref<1x3xf32, #tpu.memory_space<vmem>>, %arg1: memref<3x32xf32, #tpu.memory_space<vmem>>, %arg2: memref<1x32xf32, #tpu.memory_space<vmem>>, %arg3: memref<32x128xf32, #tpu.memory_space<vmem>>, %arg4: memref<1x128xf32, #tpu.memory_space<vmem>>, %arg5: memref<3x32xf32, #tpu.memory_space<vmem>>, %arg6: memref<1x32xf32, #tpu.memory_space<vmem>>, %arg7: memref<32x576xf32, #tpu.memory_space<vmem>>, %arg8: memref<1x576xf32, #tpu.memory_space<vmem>>, %arg9: memref<3x32xf32, #tpu.memory_space<vmem>>, %arg10: memref<1x32xf32, #tpu.memory_space<vmem>>, %arg11: memref<32x256xf32, #tpu.memory_space<vmem>>, %arg12: memref<1x256xf32, #tpu.memory_space<vmem>>, %arg13: memref<3x32xf32, #tpu.memory_space<vmem>>, %arg14: memref<1x32xf32, #tpu.memory_space<vmem>>, %arg15: memref<32x512xf32, #tpu.memory_space<vmem>>, %arg16: memref<1x512xf32, #tpu.memory_space<vmem>>, %arg17: memref<1x128xf32, #tpu.memory_space<vmem>>, %arg18: memref<1x576xf32, #tpu.memory_space<vmem>>, %arg19: memref<1x256xf32, #tpu.memory_space<vmem>>, %arg20: memref<1x512xf32, #tpu.memory_space<vmem>>) attributes {dimension_semantics = [], scalar_prefetch = 0 : i64, scratch_operands = 0 : i64, tpu.core_type = #tpu.core_type<tc>} {
    %c0 = arith.constant 0 : index
    %c0_0 = arith.constant 0 : index
    %0 = vector.load %arg0[%c0, %c0_0] : memref<1x3xf32, #tpu.memory_space<vmem>>, vector<1x3xf32>
    %c0_1 = arith.constant 0 : index
    %c0_2 = arith.constant 0 : index
    %1 = vector.load %arg1[%c0_1, %c0_2] : memref<3x32xf32, #tpu.memory_space<vmem>>, vector<3x32xf32>
    %cst = arith.constant dense<0.000000e+00> : vector<1x32xf32>
    %2 = tpu.matmul %0, %1, %cst {dimension_numbers = #tpu.dot_dimension_numbers<[1], [0], [0], [1], [0, 0, 1, 1], [], []>} : vector<1x3xf32>, vector<3x32xf32>, vector<1x32xf32> -> vector<1x32xf32>
    %c0_3 = arith.constant 0 : index
    %c0_4 = arith.constant 0 : index
    %3 = vector.load %arg2[%c0_3, %c0_4] : memref<1x32xf32, #tpu.memory_space<vmem>>, vector<1x32xf32>
    %4 = arith.addf %2, %3 : vector<1x32xf32>
    %cst_5 = arith.constant 0.000000e+00 : f32
    %5 = vector.broadcast %cst_5 : f32 to vector<1x32xf32>
    %6 = arith.maximumf %4, %5 : vector<1x32xf32>
    %c0_6 = arith.constant 0 : index
    %c0_7 = arith.constant 0 : index
    %7 = vector.load %arg3[%c0_6, %c0_7] : memref<32x128xf32, #tpu.memory_space<vmem>>, vector<32x128xf32>
    %cst_8 = arith.constant dense<0.000000e+00> : vector<1x128xf32>
    %8 = tpu.matmul %6, %7, %cst_8 {dimension_numbers = #tpu.dot_dimension_numbers<[1], [0], [0], [1], [0, 0, 1, 1], [], []>} : vector<1x32xf32>, vector<32x128xf32>, vector<1x128xf32> -> vector<1x128xf32>
    %c0_9 = arith.constant 0 : index
    %c0_10 = arith.constant 0 : index
    %9 = vector.load %arg4[%c0_9, %c0_10] : memref<1x128xf32, #tpu.memory_space<vmem>>, vector<1x128xf32>
    %10 = arith.addf %8, %9 : vector<1x128xf32>
    %c0_11 = arith.constant 0 : index
    %c0_12 = arith.constant 0 : index
    %11 = vector.load %arg17[%c0_11, %c0_12] : memref<1x128xf32, #tpu.memory_space<vmem>>, vector<1x128xf32>
    tpu.vector_store %arg17[%c0_11, %c0_12], %10 {strides = array<i32>} : memref<1x128xf32, #tpu.memory_space<vmem>>, vector<1x128xf32>,
    %c0_13 = arith.constant 0 : index
    %c0_14 = arith.constant 0 : index
    %12 = vector.load %arg5[%c0_13, %c0_14] : memref<3x32xf32, #tpu.memory_space<vmem>>, vector<3x32xf32>
    %cst_15 = arith.constant dense<0.000000e+00> : vector<1x32xf32>
    %13 = tpu.matmul %0, %12, %cst_15 {dimension_numbers = #tpu.dot_dimension_numbers<[1], [0], [0], [1], [0, 0, 1, 1], [], []>} : vector<1x3xf32>, vector<3x32xf32>, vector<1x32xf32> -> vector<1x32xf32>
    %c0_16 = arith.constant 0 : index
    %c0_17 = arith.constant 0 : index
    %14 = vector.load %arg6[%c0_16, %c0_17] : memref<1x32xf32, #tpu.memory_space<vmem>>, vector<1x32xf32>
    %15 = arith.addf %13, %14 : vector<1x32xf32>
    %cst_18 = arith.constant 0.000000e+00 : f32
    %16 = vector.broadcast %cst_18 : f32 to vector<1x32xf32>
    %17 = arith.maximumf %15, %16 : vector<1x32xf32>
    %c0_19 = arith.constant 0 : index
    %c0_20 = arith.constant 0 : index
    %18 = vector.load %arg7[%c0_19, %c0_20] : memref<32x576xf32, #tpu.memory_space<vmem>>, vector<32x576xf32>
    %cst_21 = arith.constant dense<0.000000e+00> : vector<1x576xf32>
    %19 = tpu.matmul %17, %18, %cst_21 {dimension_numbers = #tpu.dot_dimension_numbers<[1], [0], [0], [1], [0, 0, 1, 1], [], []>} : vector<1x32xf32>, vector<32x576xf32>, vector<1x576xf32> -> vector<1x576xf32>
    %c0_22 = arith.constant 0 : index
    %c0_23 = arith.constant 0 : index
    %20 = vector.load %arg8[%c0_22, %c0_23] : memref<1x576xf32, #tpu.memory_space<vmem>>, vector<1x576xf32>
    %21 = arith.addf %19, %20 : vector<1x576xf32>
    %c0_24 = arith.constant 0 : index
    %c0_25 = arith.constant 0 : index
    %22 = vector.load %arg18[%c0_24, %c0_25] : memref<1x576xf32, #tpu.memory_space<vmem>>, vector<1x576xf32>
    tpu.vector_store %arg18[%c0_24, %c0_25], %21 {strides = array<i32>} : memref<1x576xf32, #tpu.memory_space<vmem>>, vector<1x576xf32>,
    %c0_26 = arith.constant 0 : index
    %c0_27 = arith.constant 0 : index
    %23 = vector.load %arg9[%c0_26, %c0_27] : memref<3x32xf32, #tpu.memory_space<vmem>>, vector<3x32xf32>
    %cst_28 = arith.constant dense<0.000000e+00> : vector<1x32xf32>
    %24 = tpu.matmul %0, %23, %cst_28 {dimension_numbers = #tpu.dot_dimension_numbers<[1], [0], [0], [1], [0, 0, 1, 1], [], []>} : vector<1x3xf32>, vector<3x32xf32>, vector<1x32xf32> -> vector<1x32xf32>
    %c0_29 = arith.constant 0 : index
    %c0_30 = arith.constant 0 : index
    %25 = vector.load %arg10[%c0_29, %c0_30] : memref<1x32xf32, #tpu.memory_space<vmem>>, vector<1x32xf32>
    %26 = arith.addf %24, %25 : vector<1x32xf32>
    %cst_31 = arith.constant 0.000000e+00 : f32
    %27 = vector.broadcast %cst_31 : f32 to vector<1x32xf32>
    %28 = arith.maximumf %26, %27 : vector<1x32xf32>
    %c0_32 = arith.constant 0 : index
    %c0_33 = arith.constant 0 : index
    %29 = vector.load %arg11[%c0_32, %c0_33] : memref<32x256xf32, #tpu.memory_space<vmem>>, vector<32x256xf32>
    %cst_34 = arith.constant dense<0.000000e+00> : vector<1x256xf32>
    %30 = tpu.matmul %28, %29, %cst_34 {dimension_numbers = #tpu.dot_dimension_numbers<[1], [0], [0], [1], [0, 0, 1, 1], [], []>} : vector<1x32xf32>, vector<32x256xf32>, vector<1x256xf32> -> vector<1x256xf32>
    %c0_35 = arith.constant 0 : index
    %c0_36 = arith.constant 0 : index
    %31 = vector.load %arg12[%c0_35, %c0_36] : memref<1x256xf32, #tpu.memory_space<vmem>>, vector<1x256xf32>
    %32 = arith.addf %30, %31 : vector<1x256xf32>
    %c0_37 = arith.constant 0 : index
    %c0_38 = arith.constant 0 : index
    %33 = vector.load %arg19[%c0_37, %c0_38] : memref<1x256xf32, #tpu.memory_space<vmem>>, vector<1x256xf32>
    tpu.vector_store %arg19[%c0_37, %c0_38], %32 {strides = array<i32>} : memref<1x256xf32, #tpu.memory_space<vmem>>, vector<1x256xf32>,
    %c0_39 = arith.constant 0 : index
    %c0_40 = arith.constant 0 : index
    %34 = vector.load %arg13[%c0_39, %c0_40] : memref<3x32xf32, #tpu.memory_space<vmem>>, vector<3x32xf32>
    %cst_41 = arith.constant dense<0.000000e+00> : vector<1x32xf32>
    %35 = tpu.matmul %0, %34, %cst_41 {dimension_numbers = #tpu.dot_dimension_numbers<[1], [0], [0], [1], [0, 0, 1, 1], [], []>} : vector<1x3xf32>, vector<3x32xf32>, vector<1x32xf32> -> vector<1x32xf32>
    %c0_42 = arith.constant 0 : index
    %c0_43 = arith.constant 0 : index
    %36 = vector.load %arg14[%c0_42, %c0_43] : memref<1x32xf32, #tpu.memory_space<vmem>>, vector<1x32xf32>
    %37 = arith.addf %35, %36 : vector<1x32xf32>
    %cst_44 = arith.constant 0.000000e+00 : f32
    %38 = vector.broadcast %cst_44 : f32 to vector<1x32xf32>
    %39 = arith.maximumf %37, %38 : vector<1x32xf32>
    %c0_45 = arith.constant 0 : index
    %c0_46 = arith.constant 0 : index
    %40 = vector.load %arg15[%c0_45, %c0_46] : memref<32x512xf32, #tpu.memory_space<vmem>>, vector<32x512xf32>
    %cst_47 = arith.constant dense<0.000000e+00> : vector<1x512xf32>
    %41 = tpu.matmul %39, %40, %cst_47 {dimension_numbers = #tpu.dot_dimension_numbers<[1], [0], [0], [1], [0, 0, 1, 1], [], []>} : vector<1x32xf32>, vector<32x512xf32>, vector<1x512xf32> -> vector<1x512xf32>
    %c0_48 = arith.constant 0 : index
    %c0_49 = arith.constant 0 : index
    %42 = vector.load %arg16[%c0_48, %c0_49] : memref<1x512xf32, #tpu.memory_space<vmem>>, vector<1x512xf32>
    %43 = arith.addf %41, %42 : vector<1x512xf32>
    %c0_50 = arith.constant 0 : index
    %c0_51 = arith.constant 0 : index
    %44 = vector.load %arg20[%c0_50, %c0_51] : memref<1x512xf32, #tpu.memory_space<vmem>>, vector<1x512xf32>
    tpu.vector_store %arg20[%c0_50, %c0_51], %43 {strides = array<i32>} : memref<1x512xf32, #tpu.memory_space<vmem>>, vector<1x512xf32>,
    return
  }
}

</mosaic_0001>

<bundles_post_ra>
// kernel: tpu_custom_call.1
= control target key start
LH: loop header
LB: loop body
LE: loop exit
PB: predicated region body
PF: predicated region fallthrough
CT: control target
= control target key end

     0   :  { %s1547_s0 = inlined_call_operand.hbm [shape: f32[1,3], index: 0, kind: input, shape index: {}]   ;;  %s1548_s1 = inlined_call_operand.hbm [shape: f32[3,32], index: 1, kind: input, shape index: {}]   ;;  %s1549_s2 = inlined_call_operand.hbm [shape: f32[1,32], index: 2, kind: input, shape index: {}]   ;;  %s1550_s3 = inlined_call_operand.hbm [shape: f32[32,128], index: 3, kind: input, shape index: {}]   ;;  %s1551_s4 = inlined_call_operand.hbm [shape: f32[1,128], index: 4, kind: input, shape index: {}]   ;;  %s1552_s5 = inlined_call_operand.hbm [shape: f32[3,32], index: 5, kind: input, shape index: {}]   ;;  %s1553_s6 = inlined_call_operand.hbm [shape: f32[1,32], index: 6, kind: input, shape index: {}]   ;;  %s1554_s7 = inlined_call_operand.hbm [shape: f32[32,576], index: 7, kind: input, shape index: {}]   ;;  %s1555_s8 = inlined_call_operand.vmem [shape: f32[1,576], index: 8, kind: input, shape index: {}]   ;;  %s1556_s9 = inlined_call_operand.hbm [shape: f32[3,32], index: 9, kind: input, shape index: {}]   ;;  %s1557_s10 = inlined_call_operand.hbm [shape: f32[1,32], index: 10, kind: input, shape index: {}]   ;;  %s1558_s11 = inlined_call_operand.hbm [shape: f32[32,256], index: 11, kind: input, shape index: {}]   ;;  %s1559_s12 = inlined_call_operand.hbm [shape: f32[1,256], index: 12, kind: input, shape index: {}]   ;;  %s1560_s13 = inlined_call_operand.vmem [shape: f32[3,32], index: 13, kind: input, shape index: {}]   ;;  %s1561_s14 = inlined_call_operand.hbm [shape: f32[1,32], index: 14, kind: input, shape index: {}]   ;;  %s1562_s15 = inlined_call_operand.hbm [shape: f32[32,512], index: 15, kind: input, shape index: {}]   ;;  %s1563_s16 = inlined_call_operand.vmem [shape: f32[1,512], index: 16, kind: input, shape index: {}]   ;;  %s1564_s17 = inlined_call_operand.hbm [shape: f32[1,128], index: 17, kind: output, shape index: {0}]   ;;  %s1565_s18 = inlined_call_operand.hbm [shape: f32[1,576], index: 18, kind: output, shape index: {1}]   ;;  %s1566_s19 = inlined_call_operand.hbm [shape: f32[1,256], index: 19, kind: output, shape index: {2}]   ;;  %s1567_s20 = inlined_call_operand.hbm [shape: f32[1,512], index: 20, kind: output, shape index: {3}]  }
   0x1   :  { %1568 = sst [smem:[#allocation42_spill]] %s1547_s0 }
   0x2   :  { %1569 = sst [smem:[#allocation43_spill]] %s1548_s1 }
   0x3   :  { %1570 = sst [smem:[#allocation44_spill]] %s1549_s2 }
   0x4   :  { %1571 = sst [smem:[#allocation45_spill]] %s1550_s3 }
   0x5   :  { %1572 = sst [smem:[#allocation46_spill]] %s1551_s4 }
   0x6   :  { %1573 = sst [smem:[#allocation47_spill]] %s1563_s16 }
   0x7   :  { %1574 = sst [smem:[#allocation48_spill]] %s1567_s20 }
   0x8   :  { %26 = vsyncpa [#allocation3], 0 }
   0x9   :  { %27 = vsyncpa [#allocation6], 0 }
   0xa   :  { %28 = vsyncpa [#allocation9], 0 }
   0xb   :  { %29 = vsyncpa [#allocation12], 0 }
   0xc   :  { %30 = vsyncpa [#allocation15], 0 }
   0xd   :  { %31 = vsyncpa [#allocation18], 0 }
   0xe   :  { %32 = vsyncpa [#allocation21], 0 }
   0xf   :  { %33 = vsyncpa [#allocation24], 0 }
  0x10   :  { %34 = vsyncpa [#allocation4], 0 }
  0x11   :  { %35 = vsyncpa [#allocation27], 0  ;;  %s1575_s23 = sld [smem:[#allocation43_spill]] }
  0x17   :  { %s53_s24 = sshll.u32 %s1575_s23, 4  ;;  %s54_s24 = int_to_ptr.hbm [resolvable:$true] %s53_s24 }
  0x18   :  { %36 = vsyncpa [#allocation30], 0  ;;  %s1318_s2 = smov [#allocation5]   ;;  %s1576_s27 = sld [smem:[#allocation45_spill]] }
  0x19   :  { %s55_s25 = sshll.u32 %s1318_s2, 4  ;;  %s1319_s4 = smov [#allocation8]   ;;  %s56_s25 = int_to_ptr.vmem [resolvable:$true] %s55_s25 }
  0x1a   :  { %58 = dma.hbm_to_vmem [thread:$0]  %s54_s24, 64, %s56_s25, [#allocation6]  }
  0x1b   :  { %s76_s29 = sshll.u32 %s1319_s4, 4  ;;  %s1320_s30 = smov 128   ;;  %s77_s29 = int_to_ptr.vmem [resolvable:$true] %s76_s29 }
  0x1c   :  { %s1321_s0 = smov 8   ;;  %s99_s22 = sshll.u32 %s1552_s5, 4  ;;  %s100_s22 = int_to_ptr.hbm [resolvable:$true] %s99_s22 }
  0x1d   :  { %s1322_s23 = smov [#allocation11]   ;;  %s120_s3 = sshll.u32 %s1554_s7, 4  ;;  %s121_s3 = int_to_ptr.hbm [resolvable:$true] %s120_s3 }
  0x1e   :  { %s74_s28 = sshll.u32 %s1576_s27, 4  ;;  %s101_s2 = sshll.u32 %s1322_s23, 4  ;;  %s75_s28 = int_to_ptr.hbm [resolvable:$true] %s74_s28  ;;  %s102_s2 = int_to_ptr.vmem [resolvable:$true] %s101_s2 }
  0x1f   :  { %82 = dma.hbm_to_vmem [thread:$0]  %s75_s28, 512, %s77_s29, [#allocation9], %s1320_s30, %s1320_s30, %s1321_s0  }
  0x20   :  { %104 = dma.hbm_to_vmem [thread:$0]  %s100_s22, 64, %s102_s2, [#allocation12]  }
  0x21   :  { %s1323_s24 = smov [#allocation14]   ;;  %s1324_s26 = smov 640  }
  0x22   :  { %s122_s25 = sshll.u32 %s1323_s24, 4  ;;  %s1325_s27 = smov 40   ;;  %s123_s25 = int_to_ptr.vmem [resolvable:$true] %s122_s25 }
  0x23   :  { %128 = dma.hbm_to_vmem [thread:$0]  %s121_s3, 2560, %s123_s25, [#allocation15], %s1324_s26, %s1324_s26, %s1325_s27  }
  0x24   :  { %s147_s5 = sshll.u32 %s1557_s10, 4  ;;  %s1326_s29 = smov [#allocation17]   ;;  %s148_s5 = int_to_ptr.hbm [resolvable:$true] %s147_s5 }
  0x25   :  { %s149_s30 = sshll.u32 %s1326_s29, 4  ;;  %s171_s7 = sshll.u32 %s1559_s12, 4  ;;  %s150_s30 = int_to_ptr.vmem [resolvable:$true] %s149_s30  ;;  %s172_s7 = int_to_ptr.hbm [resolvable:$true] %s171_s7 }
  0x26   :  { %152 = dma.hbm_to_vmem [thread:$0]  %s148_s5, 16, %s150_s30, [#allocation18]  }
  0x27   :  { %s1327_s16 = smov [#allocation20]   ;;  %s1577_s23 = sld [smem:[#allocation42_spill]] }
  0x28   :  { %s173_s20 = sshll.u32 %s1327_s16, 4  ;;  %s1578_s24 = sld [smem:[#allocation44_spill]]  ;;  %s174_s20 = int_to_ptr.vmem [resolvable:$true] %s173_s20 }
  0x29   :  { %176 = dma.hbm_to_vmem [thread:$0]  %s172_s7, 32, %s174_s20, [#allocation21]  }
  0x2a   :  { %s1328_s26 = smov [#allocation2]   ;;  %s1329_s12 = smov [#allocation7]  }
  0x2b   :  { %s44_s27 = sshll.u32 %s1328_s26, 4  ;;  %s66_s28 = sshll.u32 %s1329_s12, 4  ;;  %s45_s27 = int_to_ptr.vmem [resolvable:$true] %s44_s27  ;;  %s67_s28 = int_to_ptr.vmem [resolvable:$true] %s66_s28 }
  0x2c   :  { %s1579_s29 = sld [smem:[#allocation46_spill]]  ;;  %s110_s7 = sshll.u32 %s1553_s6, 4  ;;  %s111_s7 = int_to_ptr.hbm [resolvable:$true] %s110_s7 }
  0x2d   :  { %s42_s2 = sshll.u32 %s1577_s23, 4  ;;  %s1330_s16 = smov [#allocation10]   ;;  %s43_s2 = int_to_ptr.hbm [resolvable:$true] %s42_s2 }
  0x2e   :  { %s64_s25 = sshll.u32 %s1578_s24, 4  ;;  %s90_s20 = sshll.u32 %s1330_s16, 4  ;;  %s65_s25 = int_to_ptr.hbm [resolvable:$true] %s64_s25  ;;  %s91_s20 = int_to_ptr.vmem [resolvable:$true] %s90_s20 }
  0x2f   :  { %47 = dma.hbm_to_vmem [thread:$0]  %s43_s2, 16, %s45_s27, [#allocation3]  }
  0x30   :  { %69 = dma.hbm_to_vmem [thread:$0]  %s65_s25, 16, %s67_s28, [#allocation6]  }
  0x31   :  { %s1331_s1 = smov [#allocation13]   ;;  %s136_s10 = sshll.u32 %s1556_s9, 4  ;;  %s137_s10 = int_to_ptr.hbm [resolvable:$true] %s136_s10 }
  0x32   :  { %s88_s30 = sshll.u32 %s1579_s29, 4  ;;  %s112_s22 = sshll.u32 %s1331_s1, 4  ;;  %s89_s30 = int_to_ptr.hbm [resolvable:$true] %s88_s30  ;;  %s113_s22 = int_to_ptr.vmem [resolvable:$true] %s112_s22 }
  0x33   :  { %93 = dma.hbm_to_vmem [thread:$0]  %s89_s30, 16, %s91_s20, [#allocation9]  }
  0x34   :  { %115 = dma.hbm_to_vmem [thread:$0]  %s111_s7, 16, %s113_s22, [#allocation12]  }
  0x35   :  { %s157_s25 = sshll.u32 %s1558_s11, 4  ;;  %s1332_s26 = smov [#allocation16]   ;;  %s158_s25 = int_to_ptr.hbm [resolvable:$true] %s157_s25 }
  0x36   :  { %s138_s6 = sshll.u32 %s1332_s26, 4  ;;  %s1333_s27 = smov [#allocation19]   ;;  %s139_s6 = int_to_ptr.vmem [resolvable:$true] %s138_s6 }
  0x37   :  { %141 = dma.hbm_to_vmem [thread:$0]  %s137_s10, 64, %s139_s6, [#allocation15]  }
  0x38   :  { %s159_s12 = sshll.u32 %s1333_s27, 4  ;;  %s1334_s28 = smov 256   ;;  %s160_s12 = int_to_ptr.vmem [resolvable:$true] %s159_s12 }
  0x39   :  { %s1335_s4 = smov 16   ;;  %s184_s29 = sshll.u32 %s1561_s14, 4  ;;  %s185_s29 = int_to_ptr.hbm [resolvable:$true] %s184_s29 }
  0x3a   :  { %165 = dma.hbm_to_vmem [thread:$0]  %s158_s25, 1024, %s160_s12, [#allocation18], %s1334_s28, %s1334_s28, %s1335_s4  }
  0x3b   :  { %s1336_s30 = smov [#allocation22]   ;;  %s194_s7 = sshll.u32 %s1562_s15, 4  ;;  %s195_s7 = int_to_ptr.hbm [resolvable:$true] %s194_s7 }
  0x3c   :  { %s186_s0 = sshll.u32 %s1336_s30, 4  ;;  %s1337_s16 = smov [#allocation23]   ;;  %s187_s0 = int_to_ptr.vmem [resolvable:$true] %s186_s0 }
  0x3d   :  { %189 = dma.hbm_to_vmem [thread:$0]  %s185_s29, 16, %s187_s0, [#allocation21]  }
  0x3e   :  { %s196_s20 = sshll.u32 %s1337_s16, 4  ;;  %s1338_s1 = smov 512   ;;  %s197_s20 = int_to_ptr.vmem [resolvable:$true] %s196_s20 }
  0x3f   :  { %s1339_s22 = smov 32  }
  0x40   :  { %202 = dma.hbm_to_vmem [thread:$0]  %s195_s7, 2048, %s197_s20, [#allocation24], %s1338_s1, %s1338_s1, %s1339_s22  }
  0x41   :  { %1296 = dma.done.wait [#allocation3], 16  }
  0x42   :  { %1297 = vsyncadd [#allocation3], 4294967280 }
  0x43   :  { %1298 = dma.done.wait [#allocation6], 80  }
  0x44   :  { %1299 = vsyncadd [#allocation6], 4294967216 }
  0x45   :  { %1300 = dma.done.wait [#allocation9], 528  }
  0x46   :  { %1301 = vsyncadd [#allocation9], 4294966768 }
  0x47   :  { %1302 = dma.done.wait [#allocation12], 80  }
  0x48   :  { %1303 = vsyncadd [#allocation12], 4294967216 }
  0x49   :  { %1304 = dma.done.wait [#allocation15], 2624  }
  0x4a   :  { %1305 = vsyncadd [#allocation15], 4294964672 }
  0x4b   :  { %1306 = dma.done.wait [#allocation18], 1040  }
  0x4c   :  { %1307 = vsyncadd [#allocation18], 4294966256 }
  0x4d   :  { %1308 = dma.done.wait [#allocation21], 48  }
  0x4e   :  { %1309 = vsyncadd [#allocation21], 4294967248 }
  0x4f   :  { %1310 = dma.done.wait [#allocation24], 2048  }
  0x50   :  { %1311 = vsyncadd [#allocation24], 4294965248  ;;  %vm268_vm0 = vcmask 1042432   ;;  %vm264_vm1 = vcmask 23552   ;;  %v262_v0 = vld [vmem:[#allocation5] sm:$0x7] }
  0x51   :  { %v323_v1 = vld [vmem:[#allocation11] sm:$0x7]  ;;  %v1491_v2 = vld [vmem:[#allocation2] sm:$0x1]  ;;  %818 = vmatpush.msk.msra.mxu0 %vm268_vm0, %v262_v0  ;;  %v295_v4 = vld [vmem:[#allocation8 + $0x10] sm:$0xff]  ;;  %vm298_vm2 = vcmask 261120  }
  0x52   :  { %821 = vmatpush.msk.msra.mxu2 %vm268_vm0, %v323_v1  ;;  %v296_v3 = vld [vmem:[#allocation8 + $0x18] sm:$0xff]  ;;  %819 = vmatmul.msk.f32.vlgmr.msra.gmra.mxu0 %vm264_vm1, %v1491_v2  ;;  %v294_v5 = vld [vmem:[#allocation8 + $0x8] sm:$0xff]  ;;  %v293_v6 = vld [vmem:[#allocation8] sm:$0xff]  ;;  %vm493_vm3 = vcmask 1040384   ;;  %vm495_vm4 = vcmask 1041408   ;;  %vm497_vm5 = vcmask 1043459  }
  0x53   :  { %822 = vmatmul.msk.f32.vlgmr.msra.gmra.mxu2 %vm264_vm1, %v1491_v2  ;;  %314 = vmatpush.msra.mxu1 %v296_v3  ;;  %v364_v7 = vld [vmem:[#allocation14 + $0x78] sm:$0xff]  ;;  %v365_v8 = vld [vmem:[#allocation14 + $0x80] sm:$0xff]  ;;  %v366_v9 = vld [vmem:[#allocation14 + $0x88] sm:$0xff]  ;;  %s765_s24 = sshll.u32 %s1565_s18, 4  ;;  %s754_s6 = sshll.u32 %s1564_s17, 4  ;;  %vm740_vm8 = vcmask 1042434   ;;  %s766_s24 = int_to_ptr.hbm [resolvable:$true] %s765_s24  ;;  %s755_s6 = int_to_ptr.hbm [resolvable:$true] %s754_s6 }
  0x54   :  { %396 = vmatpush.msra.mxu3 %v364_v7  ;;  %416 = vmatpush.msrb.mxu0 %v365_v8  ;;  %v359_v10 = vld [vmem:[#allocation14 + $0x50] sm:$0xff]  ;;  %v360_v11 = vld [vmem:[#allocation14 + $0x58] sm:$0xff]  ;;  %v361_v12 = vld [vmem:[#allocation14 + $0x60] sm:$0xff]  ;;  %s1341_s27 = smov [#allocation25]   ;;  %s1342_s28 = smov [#allocation28]  }
  0x55   :  { %315 = vmatpush.msra.mxu1 %v295_v4  ;;  %436 = vmatpush.msrb.mxu2 %v366_v9  ;;  %v367_v13 = vld [vmem:[#allocation14 + $0x90] sm:$0xff]  ;;  %v354_v14 = vld [vmem:[#allocation14 + $0x28] sm:$0xff]  ;;  %v356_v16 = vld [vmem:[#allocation14 + $0x38] sm:$0xff]  ;;  %s752_s12 = sshll.u32 %s1341_s27, 4  ;;  %s774_s18 = sshll.u32 %s1342_s28, 4  ;;  %s753_s12 = int_to_ptr.vmem [resolvable:$true] %s752_s12  ;;  %s775_s18 = int_to_ptr.vmem [resolvable:$true] %s774_s18 }
  0x56   :  { %397 = vmatpush.msra.mxu3 %v359_v10  ;;  %417 = vmatpush.msrb.mxu0 %v360_v11  ;;  %v355_v15 = vld [vmem:[#allocation14 + $0x30] sm:$0xff]  ;;  %v362_v17 = vld [vmem:[#allocation14 + $0x68] sm:$0xff]  ;;  %v349_v18 = vld [vmem:[#allocation14] sm:$0xff]  ;;  %s776_s9 = sshll.u32 %s1566_s19, 4  ;;  %s1580_s30 = sld [smem:[#allocation47_spill]]  ;;  %s777_s9 = int_to_ptr.hbm [resolvable:$true] %s776_s9 }
  0x57   :  { %316 = vmatpush.msra.mxu1 %v294_v5  ;;  %437 = vmatpush.msrb.mxu2 %v361_v12  ;;  %v350_v19 = vld [vmem:[#allocation14 + $0x8] sm:$0xff]  ;;  %v351_v20 = vld [vmem:[#allocation14 + $0x10] sm:$0xff]  ;;  %v357_v21 = vld [vmem:[#allocation14 + $0x40] sm:$0xff]  ;;  %s1343_s19 = smov [#allocation29]   ;;  %s1581_s7 = sld [smem:[#allocation48_spill]] }
  0x58   :  { %398 = vmatpush.msra.mxu3 %v354_v14  ;;  %418 = vmatpush.msrb.mxu0 %v355_v15  ;;  %v368_v22 = vld [vmem:[#allocation14 + $0x98] sm:$0xff]  ;;  %v363_v24 = vld [vmem:[#allocation14 + $0x70] sm:$0xff]  ;;  %v358_v25 = vld [vmem:[#allocation14 + $0x48] sm:$0xff]  ;;  %s785_s0 = sshll.u32 %s1343_s19, 4  ;;  %s786_s0 = int_to_ptr.vmem [resolvable:$true] %s785_s0 }
  0x59   :  { %317 = vmatpush.msra.mxu1 %v293_v6  ;;  %438 = vmatpush.msrb.mxu2 %v356_v16  ;;  %v352_v23 = vld [vmem:[#allocation14 + $0x18] sm:$0xff]  ;;  %v506_v26 = vld [vmem:[#allocation16] sm:$0x7]  ;;  %v263_v28 = vld [vmem:[#allocation7] sm:$0x1] }
  0x5a   :  { %399 = vmatpush.msra.mxu3 %v349_v18  ;;  %419 = vmatpush.msrb.mxu0 %v350_v19  ;;  %v353_v27 = vld [vmem:[#allocation14 + $0x20] sm:$0xff]  ;;  %v324_v32 = vld [vmem:[#allocation13] sm:$0x1]  ;;  %v538_v37 = vld [vmem:[#allocation19 + $0x30] sm:$0xff] }
  0x5b   :  { %456 = vmatpush.msrb.mxu1 %v367_v13  ;;  %439 = vmatpush.msrb.mxu2 %v351_v20  ;;  %v597_v36 = vld [vmem:[%s1560_s13] sm:$0x7]  ;;  %v536_v38 = vld [vmem:[#allocation19 + $0x20] sm:$0xff]  ;;  %v534_v39 = vld [vmem:[#allocation19 + $0x10] sm:$0xff]  ;;  %v501_v20 = vlaneseq }
  0x5c   :  { %476 = vmatpush.msrb.mxu3 %v368_v22  ;;  %828 = vmatpush.msk.msra.mxu0 %vm268_vm0, %v506_v26  ;;  %v539_v40 = vld [vmem:[#allocation19 + $0x38] sm:$0xff]  ;;  %v532_v41 = vld [vmem:[#allocation19] sm:$0xff]  ;;  %v537_v42 = vld [vmem:[#allocation19 + $0x28] sm:$0xff] }
  0x5d   :  { %457 = vmatpush.msrb.mxu1 %v362_v17  ;;  %561 = vmatpush.msra.mxu2 %v538_v37  ;;  %v535_v43 = vld [vmem:[#allocation19 + $0x18] sm:$0xff]  ;;  %v533_v44 = vld [vmem:[#allocation19 + $0x8] sm:$0xff]  ;;  %v297_v53 = vld [vmem:[#allocation10] sm:$0x1]  ;;  %vm503_vm6 = vcmp.lt.s32.totalorder %v501_v20, 576  ;;  %vm594_vm7 = vcmp.lt.s32.totalorder %v501_v20, 256 }
  0x5e   :  { %477 = vmatpush.msrb.mxu3 %v363_v24  ;;  %v636_v45 = vld [vmem:[#allocation23 + $0x68] sm:$0xff]  ;;  %v638_v46 = vld [vmem:[#allocation23 + $0x78] sm:$0xff]  ;;  %v635_v47 = vld [vmem:[#allocation23 + $0x60] sm:$0xff]  ;;  %s787_s16 = sshll.u32 %s1581_s7, 4  ;;  %vm744_vm9 = vcmp.lt.s32.totalorder %v501_v20, 512  ;;  %s788_s16 = int_to_ptr.hbm [resolvable:$true] %s787_s16 }
  0x5f   :  { %458 = vmatpush.msrb.mxu1 %v357_v21  ;;  %562 = vmatpush.msra.mxu2 %v536_v38  ;;  %v637_v48 = vld [vmem:[#allocation23 + $0x70] sm:$0xff]  ;;  %v632_v49 = vld [vmem:[#allocation23 + $0x48] sm:$0xff]  ;;  %v634_v50 = vld [vmem:[#allocation23 + $0x58] sm:$0xff] }
  0x60   :  { %478 = vmatpush.msrb.mxu3 %v358_v25  ;;  %v631_v51 = vld [vmem:[#allocation23 + $0x40] sm:$0xff]  ;;  %v633_v52 = vld [vmem:[#allocation23 + $0x50] sm:$0xff]  ;;  %v628_v54 = vld [vmem:[#allocation23 + $0x28] sm:$0xff] }
  0x61   :  { %459 = vmatpush.msrb.mxu1 %v352_v23  ;;  %563 = vmatpush.msra.mxu2 %v534_v39  ;;  %v630_v55 = vld [vmem:[#allocation23 + $0x38] sm:$0xff]  ;;  %v627_v56 = vld [vmem:[#allocation23 + $0x20] sm:$0xff]  ;;  %v629_v57 = vld [vmem:[#allocation23 + $0x30] sm:$0xff] }
  0x62   :  { %479 = vmatpush.msrb.mxu3 %v353_v27  ;;  %v624_v58 = vld [vmem:[#allocation23 + $0x8] sm:$0xff]  ;;  %v626_v59 = vld [vmem:[#allocation23 + $0x18] sm:$0xff]  ;;  %v623_v61 = vld [vmem:[#allocation23] sm:$0xff] }
  0x63   :  { %564 = vmatpush.msra.mxu2 %v532_v41  ;;  %v625_v62 = vld [vmem:[#allocation23 + $0x10] sm:$0xff]  ;;  %v507_v4 = vld [vmem:[#allocation17] sm:$0x1] }
  0x64   :  { %v369_v1 = vld [vmem:[%s1555_s8] sm:$0x1f]  ;;  %s1340_s8 = smov [#allocation26]  }
  0x65   :  { %v373_v5 = vperm.slane %v369_v1, 2  ;;  %v371_v6 = vperm.slane %v369_v1, 0  ;;  %v374_v9 = vperm.slane %v369_v1, 3  ;;  %v375_v15 = vperm.slane %v369_v1, 4  ;;  %s763_s2 = sshll.u32 %s1340_s8, 4  ;;  %s764_s2 = int_to_ptr.vmem [resolvable:$true] %s763_s2 }
  0xcf   :  { %v289_v29 = vpop.f32.mrf.mxu0 }
  0xd0   :  { %v290_v30 = vadd.f32 %v289_v29, %v263_v28  ;;  %v598_v28 = vld [vmem:[#allocation22] sm:$0x1] }
  0xd2   :  { %v292_v31 = vmax.f32 %v290_v30, 0.0 }
  0xd4   :  { %820 = vmatmul.msk.f32.vlgmr.msra.gmra.mxu1 %vm298_vm2, %v292_v31 }
  0xd5   :  { %581 = vmatpush.msra.mxu1 %v539_v40 }
  0xd6   :  { %v345_v33 = vpop.f32.mrf.mxu2 }
  0xd7   :  { %v346_v34 = vadd.f32 %v345_v33, %v324_v32  ;;  %582 = vmatpush.msra.mxu1 %v537_v42  ;;  %v540_v33 = vld [vmem:[#allocation20] sm:$0x3]  ;;  %v639_v42 = vld [vmem:[%s1580_s30] sm:$0xf] }
  0xd8   :  { %v542_v37 = vperm.slane %v540_v33, 0 }
  0xd9   :  { %v348_v35 = vmax.f32 %v346_v34, 0.0  ;;  %583 = vmatpush.msra.mxu1 %v535_v43  ;;  %v543_v34 = vperm.slane %v540_v33, 1  ;;  %v643_v43 = vperm.slane %v639_v42, 2 }
  0xdb   :  { %823 = vmatmul.msk.f32.vlgmr.msra.gmra.mxu3 %vm298_vm2, %v348_v35  ;;  %824 = vmatmul.msk.f32.vlgmr.msrb.gmra.mxu0 %vm298_vm2, %v348_v35 }
  0xdc   :  { %825 = vmatmul.msk.f32.vlgmr.msrb.gmra.mxu2 %vm298_vm2, %v348_v35  ;;  %832 = vmatpush.msk.msra.mxu3 %vm268_vm0, %v597_v36 }
  0xdd   :  { %826 = vmatmul.msk.f32.vlgmr.msrb.gmra.mxu1 %vm298_vm2, %v348_v35  ;;  %684 = vmatpush.msrb.mxu2 %v636_v45  ;;  %v642_v45 = vperm.slane %v639_v42, 1 }
  0xde   :  { %584 = vmatpush.msra.mxu1 %v533_v44  ;;  %664 = vmatpush.msrb.mxu0 %v635_v47  ;;  %v641_v47 = vperm.slane %v639_v42, 0 }
  0xdf   :  { %685 = vmatpush.msrb.mxu2 %v632_v49 }
  0xe0   :  { %704 = vmatpush.msrb.mxu1 %v637_v48  ;;  %665 = vmatpush.msrb.mxu0 %v631_v51 }
  0xe1   :  { %686 = vmatpush.msrb.mxu2 %v628_v54 }
  0xe2   :  { %705 = vmatpush.msrb.mxu1 %v633_v52  ;;  %666 = vmatpush.msrb.mxu0 %v627_v56 }
  0xe3   :  { %827 = vmatmul.msk.f32.vlgmr.msrb.gmra.mxu3 %vm298_vm2, %v348_v35  ;;  %829 = vmatmul.msk.f32.vlgmr.msra.gmra.mxu0 %vm264_vm1, %v1491_v2 }
  0xe4   :  { %724 = vmatpush.msrb.mxu3 %v638_v46  ;;  %706 = vmatpush.msrb.mxu1 %v629_v57  ;;  %v644_v46 = vperm.slane %v639_v42, 3 }
  0xe5   :  { %687 = vmatpush.msrb.mxu2 %v624_v58  ;;  %667 = vmatpush.msrb.mxu0 %v623_v61 }
  0xe6   :  { %725 = vmatpush.msrb.mxu3 %v634_v50  ;;  %707 = vmatpush.msrb.mxu1 %v625_v62 }
  0xe8   :  { %726 = vmatpush.msrb.mxu3 %v630_v55 }
  0xea   :  { %727 = vmatpush.msrb.mxu3 %v626_v59 }
  0xeb   :  { %833 = vmatmul.msk.f32.vlgmr.msra.gmra.mxu3 %vm264_vm1, %v1491_v2  ;;  %v372_v2 = vperm.slane %v369_v1, 1 }
 0x151   :  { %v319_v60 = vpop.f32.mrf.mxu1 }
 0x152   :  { %v320_v63 = vadd.f32 %v319_v60, %v297_v53 }
 0x154   :  { %322 = vst [vmem:[#allocation25] sm:$0x1] %v320_v63 }
 0x155   :  { %757 = dma.vmem_to_hbm [thread:$0]  %s753_s12, 16, %s755_s6, [#allocation4]  }
 0x158   :  { %v421_v0 = vpop.f32.mrf.mxu0 }
 0x159   :  { %v422_v11 = vadd.f32 %v421_v0, %v372_v2 }
 0x15a   :  { %v461_v12 = vpop.f32.mrf.mxu1 }
 0x15b   :  { %v462_v17 = vadd.f32 %v461_v12, %v374_v9  ;;  %v489_v18 = vrot.slane %v422_v11, 7 }
 0x15d   :  { %v491_v24 = vrot.slane %v462_v17, 5 }
 0x15e   :  { %v401_v3 = vpop.f32.mrf.mxu3 }
 0x15f   :  { %v441_v7 = vpop.f32.mrf.mxu2  ;;  %v402_v16 = vadd.f32 %v401_v3, %v371_v6 }
 0x160   :  { %v528_v8 = vpop.f32.mrf.mxu0  ;;  %v442_v13 = vadd.f32 %v441_v7, %v373_v5 }
 0x161   :  { %v529_v10 = vadd.f32 %v528_v8, %v507_v4  ;;  %v494_v23 = vsel %vm493_vm3, %v402_v16, %v489_v18 }
 0x162   :  { %v490_v21 = vrot.slane %v442_v13, 6 }
 0x163   :  { %v531_v14 = vmax.f32 %v529_v10, 0.0 }
 0x164   :  { %v496_v26 = vsel %vm495_vm4, %v494_v23, %v490_v21 }
 0x165   :  { %830 = vmatmul.msk.f32.vlgmr.msra.gmra.mxu2 %vm298_vm2, %v531_v14  ;;  %831 = vmatmul.msk.f32.vlgmr.msra.gmra.mxu1 %vm298_vm2, %v531_v14 }
 0x166   :  { %v481_v19 = vpop.f32.mrf.mxu3 }
 0x167   :  { %v482_v22 = vadd.f32 %v481_v19, %v375_v15 }
 0x169   :  { %v492_v25 = vrot.slane %v482_v22, 4 }
 0x16b   :  { %v498_v27 = vsel %vm497_vm5, %v491_v24, %v492_v25 }
 0x16c   :  { %v499_v29 = vsel %vm268_vm0, %v496_v26, %v498_v27 }
 0x16d   :  { %505 = vst.msk [vmem:[#allocation26] sm:$0x1f] %vm503_vm6, %v499_v29 }
 0x16e   :  { %v619_v30 = vpop.f32.mrf.mxu3  ;;  %768 = dma.vmem_to_hbm [thread:$0]  %s764_s2, 80, %s766_s24, [#allocation27]  }
 0x16f   :  { %v620_v31 = vadd.f32 %v619_v30, %v598_v28 }
 0x171   :  { %v622_v32 = vmax.f32 %v620_v31, 0.0 }
 0x173   :  { %834 = vmatmul.msk.f32.vlgmr.msrb.gmra.mxu0 %vm298_vm2, %v622_v32  ;;  %835 = vmatmul.msk.f32.vlgmr.msrb.gmra.mxu2 %vm298_vm2, %v622_v32 }
 0x174   :  { %836 = vmatmul.msk.f32.vlgmr.msrb.gmra.mxu1 %vm298_vm2, %v622_v32  ;;  %837 = vmatmul.msk.f32.vlgmr.msrb.gmra.mxu3 %vm298_vm2, %v622_v32 }
 0x1e2   :  { %v586_v35 = vpop.f32.mrf.mxu1 }
 0x1e3   :  { %v587_v36 = vadd.f32 %v586_v35, %v543_v34 }
 0x1e5   :  { %v591_v38 = vrot.slane %v587_v36, 7 }
 0x1e8   :  { %v566_v39 = vpop.f32.mrf.mxu2 }
 0x1e9   :  { %v567_v40 = vadd.f32 %v566_v39, %v542_v37 }
 0x1eb   :  { %v592_v41 = vsel %vm493_vm3, %v567_v40, %v591_v38 }
 0x1ec   :  { %596 = vst.msk [vmem:[#allocation28] sm:$0x3] %vm594_vm7, %v592_v41 }
 0x1ed   :  { %779 = dma.vmem_to_hbm [thread:$0]  %s775_s18, 32, %s777_s9, [#allocation27]  }
 0x1f0   :  { %v669_v48 = vpop.f32.mrf.mxu0 }
 0x1f1   :  { %v709_v44 = vpop.f32.mrf.mxu1  ;;  %v670_v54 = vadd.f32 %v669_v48, %v641_v47 }
 0x1f2   :  { %v710_v49 = vadd.f32 %v709_v44, %v643_v43 }
 0x1f4   :  { %v737_v56 = vrot.slane %v710_v49, 6 }
 0x1f6   :  { %v689_v50 = vpop.f32.mrf.mxu2 }
 0x1f7   :  { %v690_v51 = vadd.f32 %v689_v50, %v642_v45  ;;  %v729_v52 = vpop.f32.mrf.mxu3 }
 0x1f8   :  { %v730_v53 = vadd.f32 %v729_v52, %v644_v46 }
 0x1f9   :  { %v736_v55 = vrot.slane %v690_v51, 7 }
 0x1fa   :  { %v738_v57 = vrot.slane %v730_v53, 5 }
 0x1fb   :  { %v739_v58 = vsel %vm493_vm3, %v670_v54, %v736_v55 }
 0x1fc   :  { %v741_v59 = vsel %vm740_vm8, %v737_v56, %v738_v57 }
 0x1fd   :  { %v742_v60 = vsel %vm495_vm4, %v739_v58, %v741_v59 }
 0x1fe   :  { %746 = vst.msk [vmem:[#allocation29] sm:$0xf] %vm744_vm9, %v742_v60 }
 0x1ff   :  { %790 = dma.vmem_to_hbm [thread:$0]  %s786_s0, 64, %s788_s16, [#allocation30]  }
 0x200   :  { %1312 = dma.done.wait [#allocation4], 16  }
 0x201   :  { %1313 = vsyncadd [#allocation4], 4294967280 }
 0x202   :  { %1314 = dma.done.wait [#allocation27], 112  }
 0x203   :  { %1315 = vsyncadd [#allocation27], 4294967184 }
 0x204   :  { %1316 = dma.done.wait [#allocation30], 64  }
 0x205   :  { %1317 = vsyncadd [#allocation30], 4294967232 }
 0x206   :  { %807 = vsyncpa [#allocation3], 1 }
 0x207   :  { %808 = vsyncpa [#allocation6], 1 }
 0x208   :  { %809 = vsyncpa [#allocation9], 1 }
 0x209   :  { %810 = vsyncpa [#allocation12], 1 }
 0x20a   :  { %811 = vsyncpa [#allocation15], 1 }
 0x20b   :  { %812 = vsyncpa [#allocation18], 1 }
 0x20c   :  { %813 = vsyncpa [#allocation21], 1 }
 0x20d   :  { %814 = vsyncpa [#allocation24], 1 }
 0x20e   :  { %815 = vsyncpa [#allocation4], 1 }
 0x20f   :  { %816 = vsyncpa [#allocation27], 1 }
 0x210   :  { %817 = vsyncpa [#allocation30], 1 }

</bundles_post_ra>
